<compile_context>
chip_gen: v6e
topology: v6e:2x2x1
jax: 0.10.0
libtpu: 0.0.40
codegen_flags: <defaults>
</compile_context>

<pallas_src>
import jax
import jax.numpy as jnp
import numpy as np
from jax.experimental import pallas as pl
from jax.experimental.pallas import tpu as pltpu

_LANE = 128
_SUBLANE = 8
_TILE_VMEM_BUDGET = 24 * 1024 * 1024  # conservative: fits v7x(64MiB)/v6e/v5e scoped VMEM


def _round_up(x, m):
    return ((x + m - 1) // m) * m


def bilinear2_kernel(data_ref, w_ref, att_t_ref, out_ref, acc_ref):
    """out = (data @ W) @ att^T, K(=res)-tiled, f32 accumulation on the MXU."""
    k = pl.program_id(1)

    @pl.when(k == 0)
    def _():
        acc_ref[...] = jnp.zeros_like(acc_ref)

    # [bm, tk] @ [tk, att_p] -> accumulate [bm, att_p] in f32.
    acc_ref[...] += jnp.dot(data_ref[...], w_ref[...],
                            preferred_element_type=jnp.float32)

    @pl.when(k == pl.num_programs(1) - 1)
    def _():
        # [bm, att_p] @ [att_p, natt_p] -> [bm, natt_p]  (lane-dense output store)
        tmp = acc_ref[...].astype(att_t_ref.dtype)
        out_ref[...] = jnp.dot(
            tmp, att_t_ref[...], preferred_element_type=jnp.float32
        ).astype(out_ref.dtype)


def _vmem_usage(bm, tk, att_p, natt_p, in_itemsize, w_bufs):
    data_b = 2 * bm * tk * in_itemsize           # double-buffered data tiles
    w_b = w_bufs * tk * att_p * in_itemsize      # W tiles (1 buf if resident, 2 if K-tiled)
    att_b = att_p * natt_p * in_itemsize         # att^T, single-buffered (constant index)
    out_b = 2 * bm * natt_p * 4                  # double-buffered f32 output tiles
    acc_b = bm * att_p * 4                       # f32 accumulator scratch
    return data_b + w_b + att_b + out_b + acc_b


def _select_tiling(B, res, att_p, natt_p, in_itemsize):
    """Returns (bm, tk, res_p, nk)."""
    # Preferred batch tile: >=2 grid tiles when B is large (keeps both v7x TCs busy),
    # capped at 512 rows, multiple of 8 (or the full B when B is small).
    if B <= 64:
        bm_pref = B
    else:
        bm_pref = min(512, _round_up(pl.cdiv(B, 2), _SUBLANE))
    bm_cands = [bm_pref] + [c for c in (256, 128, 64, 32, 16, 8) if c < bm_pref]

    # 1) Fully-resident-W path (no K tiling; W single-buffered).
    for bm in bm_cands:
        if _vmem_usage(bm, res, att_p, natt_p, in_itemsize, w_bufs=1) <= _TILE_VMEM_BUDGET:
            return bm, res, res, 1

    # 2) K-tile the contraction (res) dimension; W becomes pipelined (double-buffered).
    res_p = _round_up(res, _LANE)
    tk_cands = [m * _LANE for m in range(res_p // _LANE, 0, -1)
                if res_p % (m * _LANE) == 0]
    for bm in bm_cands:
        for tk in tk_cands:
            if _vmem_usage(bm, tk, att_p, natt_p, in_itemsize, w_bufs=2) <= _TILE_VMEM_BUDGET:
                return bm, tk, res_p, res_p // tk

    # 3) Fallback: smallest tiles (vmem_limit below is derived from actual usage).
    return 8, _LANE, res_p, res_p // _LANE


def bilinear2_forward(data, W, att, *, input_dtype=jnp.bfloat16):
    """Bilinear2.forward: (data @ W) @ att.T  ->  [B, n_att] float32."""
    B, res = data.shape
    n_att, att_size = att.shape
    assert W.shape == (res, att_size)

    # Lane padding (zero padding is mathematically exact here).
    att_p = _round_up(att_size, _LANE)
    natt_p = _round_up(n_att, _LANE)

    in_itemsize = jnp.dtype(input_dtype).itemsize
    bm, tk, res_p, nk = _select_tiling(B, res, att_p, natt_p, in_itemsize)
    grid = (pl.cdiv(B, bm), nk)

    # Wrapper-side layout plumbing: pad, transpose att, cast inputs.
    w_p = jnp.pad(W, ((0, res_p - res), (0, att_p - att_size))).astype(input_dtype)
    att_t_p = jnp.pad(att, ((0, natt_p - n_att),
                            (0, att_p - att_size))).T.astype(input_dtype)
    data_p = data.astype(input_dtype)
    if res_p != res:
        data_p = jnp.pad(data_p, ((0, 0), (0, res_p - res)))

    flops = 2 * B * res_p * att_p + 2 * B * att_p * natt_p
    bytes_accessed = (data_p.size * in_itemsize + w_p.size * in_itemsize
                      + att_t_p.size * in_itemsize + B * natt_p * 4)
    vmem_usage = _vmem_usage(bm, tk, att_p, natt_p, in_itemsize,
                             w_bufs=1 if nk == 1 else 2)
    vmem_limit = int(min(60 << 20, max(16 << 20, vmem_usage + (8 << 20))))

    def _spec(shape, imap, mode):
        if mode is None:
            return pl.BlockSpec(shape, imap)
        return pl.BlockSpec(shape, imap, pipeline_mode=mode)

    def run(single_buffer_resident):
        resident_mode = pl.Buffered(1) if single_buffer_resident else None
        w_mode = resident_mode if nk == 1 else None
        in_specs = [
            _spec((bm, tk), lambda i, k: (i, k), None),       # data: batch/K tiled
            _spec((tk, att_p), lambda i, k: (k, 0), w_mode),  # W
            _spec((att_p, natt_p), lambda i, k: (0, 0), resident_mode),  # att^T
        ]
        return pl.pallas_call(
            bilinear2_kernel,
            out_shape=jax.ShapeDtypeStruct((B, natt_p), jnp.float32),
            grid_spec=pltpu.PrefetchScalarGridSpec(
                num_scalar_prefetch=0,
                grid=grid,
                in_specs=in_specs,
                out_specs=pl.BlockSpec((bm, natt_p), lambda i, k: (i, 0)),
                scratch_shapes=[pltpu.VMEM((bm, att_p), jnp.float32)],
            ),
            compiler_params=pltpu.CompilerParams(
                dimension_semantics=("parallel", "arbitrary"),
                vmem_limit_bytes=vmem_limit),
            cost_estimate=pl.CostEstimate(
                flops=int(flops), transcendentals=0,
                bytes_accessed=int(bytes_accessed)),
        )(data_p, w_p, att_t_p)

    try:
        out_p = run(single_buffer_resident=True)
    except Exception:
        # Fallback if Buffered(1) resident blocks are unsupported in this JAX version.
        out_p = run(single_buffer_resident=False)

    return out_p[:, :n_att]


if __name__ == "__main__":
    # Small, module-consistent sizes.
    B = 8            # batch of data rows
    res_size = 128   # opt.resSize  (dim1)
    att_size = 32    # opt.attSize  (dim2)
    n_att = 16       # number of attribute vectors (rows of att)

    key = jax.random.PRNGKey(0)
    k_w, k_d, k_a = jax.random.split(key, 3)

    # Bilinear2.W is a raw torch.randn Parameter; scaled down here only to keep test
    # magnitudes tame — forward semantics are unchanged.
    W = 0.02 * jax.random.normal(k_w, (res_size, att_size), jnp.float32)
    data = jax.random.normal(k_d, (B, res_size), jnp.float32)
    att = jax.random.normal(k_a, (n_att, att_size), jnp.float32)

    ref = np.asarray((data @ W) @ att.T)

    # float32-input path: tight tolerance.
    out_f32 = bilinear2_forward(data, W, att, input_dtype=jnp.float32)
    jax.block_until_ready(out_f32)
    np.testing.assert_allclose(np.asarray(out_f32), ref, rtol=1e-4, atol=1e-4)

    # Default bf16-input path (f32 accumulation): bf16-appropriate tolerance.
    out_bf16 = bilinear2_forward(data, W, att)
    jax.block_until_ready(out_bf16)
    np.testing.assert_allclose(np.asarray(out_bf16), ref, rtol=2e-2, atol=5e-2)

    print("KERNEL_OK")
</pallas_src>

<mosaic_0001>
module attributes {stable_mosaic.version = 11 : i64} {
  func.func @bilinear2_kernel(%arg0: i32, %arg1: i32, %arg2: memref<8x128xf32, #tpu.memory_space<vmem>>, %arg3: memref<128x128xf32, #tpu.memory_space<vmem>>, %arg4: memref<128x128xf32, #tpu.memory_space<vmem>>, %arg5: memref<8x128xf32, #tpu.memory_space<vmem>>, %arg6: memref<8x128xf32, #tpu.memory_space<vmem>>) attributes {dimension_semantics = [#tpu.dimension_semantics<parallel>, #tpu.dimension_semantics<arbitrary>], iteration_bounds = array<i64: 1, 1>, scalar_prefetch = 0 : i64, scratch_operands = 1 : i64, tpu.core_type = #tpu.core_type<tc>, window_params = [{transform_indices = @transform_0, window_bounds = array<i64: 8, 128>}, {pipeline_mode = #tpu.pipeline_mode<synchronous>, transform_indices = @transform_1, window_bounds = array<i64: 128, 128>}, {pipeline_mode = #tpu.pipeline_mode<synchronous>, transform_indices = @transform_2, window_bounds = array<i64: 128, 128>}, {transform_indices = @transform_3, window_bounds = array<i64: 8, 128>}]} {
    %c0_i32 = arith.constant 0 : i32
    %0 = arith.cmpi eq, %arg1, %c0_i32 : i32
    %1 = arith.extui %0 : i1 to i32
    %c0_i32_0 = arith.constant 0 : i32
    %2 = arith.cmpi ne, %1, %c0_i32_0 : i32
    scf.if %2 {
      %cst_10 = arith.constant 0.000000e+00 : f32
      %12 = vector.broadcast %cst_10 : f32 to vector<8x128xf32>
      %c0_11 = arith.constant 0 : index
      %c0_12 = arith.constant 0 : index
      %13 = vector.load %arg6[%c0_11, %c0_12] : memref<8x128xf32, #tpu.memory_space<vmem>>, vector<8x128xf32>
      tpu.vector_store %arg6[%c0_11, %c0_12], %12 {strides = array<i32>} : memref<8x128xf32, #tpu.memory_space<vmem>>, vector<8x128xf32>,
    } else {
    }
    %c0 = arith.constant 0 : index
    %c0_1 = arith.constant 0 : index
    %3 = vector.load %arg6[%c0, %c0_1] : memref<8x128xf32, #tpu.memory_space<vmem>>, vector<8x128xf32>
    %c0_2 = arith.constant 0 : index
    %c0_3 = arith.constant 0 : index
    %4 = vector.load %arg2[%c0_2, %c0_3] : memref<8x128xf32, #tpu.memory_space<vmem>>, vector<8x128xf32>
    %c0_4 = arith.constant 0 : index
    %c0_5 = arith.constant 0 : index
    %5 = vector.load %arg3[%c0_4, %c0_5] : memref<128x128xf32, #tpu.memory_space<vmem>>, vector<128x128xf32>
    %cst = arith.constant dense<0.000000e+00> : vector<8x128xf32>
    %6 = tpu.matmul %4, %5, %cst {dimension_numbers = #tpu.dot_dimension_numbers<[1], [0], [0], [1], [0, 0, 1, 1], [], []>} : vector<8x128xf32>, vector<128x128xf32>, vector<8x128xf32> -> vector<8x128xf32>
    %7 = arith.addf %3, %6 : vector<8x128xf32>
    %c0_6 = arith.constant 0 : index
    %c0_7 = arith.constant 0 : index
    %8 = vector.load %arg6[%c0_6, %c0_7] : memref<8x128xf32, #tpu.memory_space<vmem>>, vector<8x128xf32>
    tpu.vector_store %arg6[%c0_6, %c0_7], %7 {strides = array<i32>} : memref<8x128xf32, #tpu.memory_space<vmem>>, vector<8x128xf32>,
    %c0_i32_8 = arith.constant 0 : i32
    %9 = arith.cmpi eq, %arg1, %c0_i32_8 : i32
    %10 = arith.extui %9 : i1 to i32
    %c0_i32_9 = arith.constant 0 : i32
    %11 = arith.cmpi ne, %10, %c0_i32_9 : i32
    scf.if %11 {
      %c0_10 = arith.constant 0 : index
      %c0_11 = arith.constant 0 : index
      %12 = vector.load %arg6[%c0_10, %c0_11] : memref<8x128xf32, #tpu.memory_space<vmem>>, vector<8x128xf32>
      %c0_12 = arith.constant 0 : index
      %c0_13 = arith.constant 0 : index
      %13 = vector.load %arg4[%c0_12, %c0_13] : memref<128x128xf32, #tpu.memory_space<vmem>>, vector<128x128xf32>
      %cst_14 = arith.constant dense<0.000000e+00> : vector<8x128xf32>
      %14 = tpu.matmul %12, %13, %cst_14 {dimension_numbers = #tpu.dot_dimension_numbers<[1], [0], [0], [1], [0, 0, 1, 1], [], []>} : vector<8x128xf32>, vector<128x128xf32>, vector<8x128xf32> -> vector<8x128xf32>
      %c0_15 = arith.constant 0 : index
      %c0_16 = arith.constant 0 : index
      %15 = vector.load %arg5[%c0_15, %c0_16] : memref<8x128xf32, #tpu.memory_space<vmem>>, vector<8x128xf32>
      tpu.vector_store %arg5[%c0_15, %c0_16], %14 {strides = array<i32>} : memref<8x128xf32, #tpu.memory_space<vmem>>, vector<8x128xf32>,
    } else {
    }
    return
  }
  func.func @transform_0(%arg0: i32, %arg1: i32) -> (i32, i32) {
    %c0_i32 = arith.constant 0 : i32
    return %arg0, %arg1 : i32, i32
  }
  func.func @transform_1(%arg0: i32, %arg1: i32) -> (i32, i32) {
    %c0_i32 = arith.constant 0 : i32
    %c0_i32_0 = arith.constant 0 : i32
    return %arg1, %c0_i32 : i32, i32
  }
  func.func @transform_2(%arg0: i32, %arg1: i32) -> (i32, i32) {
    %c0_i32 = arith.constant 0 : i32
    %c0_i32_0 = arith.constant 0 : i32
    %c0_i32_1 = arith.constant 0 : i32
    return %c0_i32, %c0_i32_0 : i32, i32
  }
  func.func @transform_3(%arg0: i32, %arg1: i32) -> (i32, i32) {
    %c0_i32 = arith.constant 0 : i32
    %c0_i32_0 = arith.constant 0 : i32
    return %arg0, %c0_i32 : i32, i32
  }
}

module attributes {stable_mosaic.version = 11 : i64} {
  func.func @bilinear2_kernel(%arg0: i32, %arg1: i32, %arg2: memref<8x128xf32, #tpu.memory_space<vmem>>, %arg3: memref<128x128xf32, #tpu.memory_space<vmem>>, %arg4: memref<128x128xf32, #tpu.memory_space<vmem>>, %arg5: memref<8x128xf32, #tpu.memory_space<vmem>>, %arg6: memref<8x128xf32, #tpu.memory_space<vmem>>) attributes {dimension_semantics = [#tpu.dimension_semantics<parallel>, #tpu.dimension_semantics<arbitrary>], iteration_bounds = array<i64: 1, 1>, scalar_prefetch = 0 : i64, scratch_operands = 1 : i64, tpu.core_type = #tpu.core_type<tc>, window_params = [{transform_indices = @transform_0, window_bounds = array<i64: 8, 128>}, {transform_indices = @transform_1, window_bounds = array<i64: 128, 128>}, {pipeline_mode = #tpu.pipeline_mode<synchronous>, transform_indices = @transform_2, window_bounds = array<i64: 128, 128>}, {transform_indices = @transform_3, window_bounds = array<i64: 8, 128>}]} {
    %c0_i32 = arith.constant 0 : i32
    %0 = arith.cmpi eq, %arg1, %c0_i32 : i32
    %1 = arith.extui %0 : i1 to i32
    %c0_i32_0 = arith.constant 0 : i32
    %2 = arith.cmpi ne, %1, %c0_i32_0 : i32
    scf.if %2 {
      %cst_10 = arith.constant 0.000000e+00 : f32
      %12 = vector.broadcast %cst_10 : f32 to vector<8x128xf32>
      %c0_11 = arith.constant 0 : index
      %c0_12 = arith.constant 0 : index
      %13 = vector.load %arg6[%c0_11, %c0_12] : memref<8x128xf32, #tpu.memory_space<vmem>>, vector<8x128xf32>
      tpu.vector_store %arg6[%c0_11, %c0_12], %12 {strides = array<i32>} : memref<8x128xf32, #tpu.memory_space<vmem>>, vector<8x128xf32>,
    } else {
    }
    %c0 = arith.constant 0 : index
    %c0_1 = arith.constant 0 : index
    %3 = vector.load %arg6[%c0, %c0_1] : memref<8x128xf32, #tpu.memory_space<vmem>>, vector<8x128xf32>
    %c0_2 = arith.constant 0 : index
    %c0_3 = arith.constant 0 : index
    %4 = vector.load %arg2[%c0_2, %c0_3] : memref<8x128xf32, #tpu.memory_space<vmem>>, vector<8x128xf32>
    %c0_4 = arith.constant 0 : index
    %c0_5 = arith.constant 0 : index
    %5 = vector.load %arg3[%c0_4, %c0_5] : memref<128x128xf32, #tpu.memory_space<vmem>>, vector<128x128xf32>
    %cst = arith.constant dense<0.000000e+00> : vector<8x128xf32>
    %6 = tpu.matmul %4, %5, %cst {dimension_numbers = #tpu.dot_dimension_numbers<[1], [0], [0], [1], [0, 0, 1, 1], [], []>} : vector<8x128xf32>, vector<128x128xf32>, vector<8x128xf32> -> vector<8x128xf32>
    %7 = arith.addf %3, %6 : vector<8x128xf32>
    %c0_6 = arith.constant 0 : index
    %c0_7 = arith.constant 0 : index
    %8 = vector.load %arg6[%c0_6, %c0_7] : memref<8x128xf32, #tpu.memory_space<vmem>>, vector<8x128xf32>
    tpu.vector_store %arg6[%c0_6, %c0_7], %7 {strides = array<i32>} : memref<8x128xf32, #tpu.memory_space<vmem>>, vector<8x128xf32>,
    %c0_i32_8 = arith.constant 0 : i32
    %9 = arith.cmpi eq, %arg1, %c0_i32_8 : i32
    %10 = arith.extui %9 : i1 to i32
    %c0_i32_9 = arith.constant 0 : i32
    %11 = arith.cmpi ne, %10, %c0_i32_9 : i32
    scf.if %11 {
      %c0_10 = arith.constant 0 : index
      %c0_11 = arith.constant 0 : index
      %12 = vector.load %arg6[%c0_10, %c0_11] : memref<8x128xf32, #tpu.memory_space<vmem>>, vector<8x128xf32>
      %c0_12 = arith.constant 0 : index
      %c0_13 = arith.constant 0 : index
      %13 = vector.load %arg4[%c0_12, %c0_13] : memref<128x128xf32, #tpu.memory_space<vmem>>, vector<128x128xf32>
      %cst_14 = arith.constant dense<0.000000e+00> : vector<8x128xf32>
      %14 = tpu.matmul %12, %13, %cst_14 {dimension_numbers = #tpu.dot_dimension_numbers<[1], [0], [0], [1], [0, 0, 1, 1], [], []>} : vector<8x128xf32>, vector<128x128xf32>, vector<8x128xf32> -> vector<8x128xf32>
      %c0_15 = arith.constant 0 : index
      %c0_16 = arith.constant 0 : index
      %15 = vector.load %arg5[%c0_15, %c0_16] : memref<8x128xf32, #tpu.memory_space<vmem>>, vector<8x128xf32>
      tpu.vector_store %arg5[%c0_15, %c0_16], %14 {strides = array<i32>} : memref<8x128xf32, #tpu.memory_space<vmem>>, vector<8x128xf32>,
    } else {
    }
    return
  }
  func.func @transform_0(%arg0: i32, %arg1: i32) -> (i32, i32) {
    %c0_i32 = arith.constant 0 : i32
    return %arg0, %arg1 : i32, i32
  }
  func.func @transform_1(%arg0: i32, %arg1: i32) -> (i32, i32) {
    %c0_i32 = arith.constant 0 : i32
    %c0_i32_0 = arith.constant 0 : i32
    return %arg1, %c0_i32 : i32, i32
  }
  func.func @transform_2(%arg0: i32, %arg1: i32) -> (i32, i32) {
    %c0_i32 = arith.constant 0 : i32
    %c0_i32_0 = arith.constant 0 : i32
    %c0_i32_1 = arith.constant 0 : i32
    return %c0_i32, %c0_i32_0 : i32, i32
  }
  func.func @transform_3(%arg0: i32, %arg1: i32) -> (i32, i32) {
    %c0_i32 = arith.constant 0 : i32
    %c0_i32_0 = arith.constant 0 : i32
    return %arg0, %c0_i32 : i32, i32
  }
}

</mosaic_0001>

<bundles_post_ra>
// kernel: tpu_custom_call.1
= control target key start
LH: loop header
LB: loop body
LE: loop exit
PB: predicated region body
PF: predicated region fallthrough
CT: control target
= control target key end

     0   :  { %8 = vsyncpa [#allocation4], 0  ;;  %s528_s0 = inlined_call_operand.hbm [shape: f32[8,128], index: 0, kind: input, shape index: {}]   ;;  %s529_s1 = inlined_call_operand.hbm [shape: f32[128,128], index: 1, kind: input, shape index: {}]   ;;  %s530_s2 = inlined_call_operand.hbm [shape: f32[128,128], index: 2, kind: input, shape index: {}]   ;;  %s531_s3 = inlined_call_operand.hbm [shape: f32[8,128], index: 3, kind: output, shape index: {}]  }
   0x1   :  { %9 = vsyncpa [#allocation7], 0 }
   0x2   :  { %10 = vsyncpa [#allocation5], 0  ;;  %s454_s12 = smov [#allocation6]  }
   0x3   :  { %s26_s13 = sshll.u32 %s454_s12, 4  ;;  %s27_s13 = int_to_ptr.vmem [resolvable:$true] %s26_s13 }
   0x4   :  { %s376_s14 = scalar_lea.vmem %s27_s13, 2048  ;;  %p381_p1 = scmp.lt.s32.totalorder %s27_s13, %s27_s13 }
   0x5   :  { %p377_p0 = scmp.ne.s32.totalorder %s27_s13, %s376_s14  ;;  %p382_p2 = scmp.lt.s32.totalorder %s376_s14, %s376_s14 }
   0x7   :  { %p383_p3 = por %p382_p2, %p381_p1 }
   0x9   :  { %p384_p4 = pnand %p383_p3, %p377_p0 }
   0xb   :  { %387 = shalt.err (!%p384_p4)
}
   0xc   :  { %s455_s15 = smov 128   ;;  %s456_s16 = smov 8  }
   0xd   :  { %32 = dma.hbm_to_vmem [thread:$0]  %s529_s1, 2048, %s27_s13, [#allocation7], %s455_s15, %s455_s15, %s456_s16  }
   0xe   :  { %s457_s19 = smov [#allocation3]   ;;  %s458_s21 = smov [#allocation8]  }
   0xf   :  { %s17_s20 = sshll.u32 %s457_s19, 4  ;;  %s38_s22 = sshll.u32 %s458_s21, 4  ;;  %s18_s20 = int_to_ptr.vmem [resolvable:$true] %s17_s20  ;;  %s39_s22 = int_to_ptr.vmem [resolvable:$true] %s38_s22 }
  0x10   :  { %s396_s23 = scalar_lea.vmem %s18_s20, 128  ;;  %p401_p6 = scmp.lt.s32.totalorder %s18_s20, %s18_s20 }
  0x11   :  { %p397_p5 = scmp.ne.s32.totalorder %s18_s20, %s396_s23  ;;  %p402_p7 = scmp.lt.s32.totalorder %s396_s23, %s396_s23 }
  0x13   :  { %p403_p8 = por %p402_p7, %p401_p6 }
  0x15   :  { %p404_p9 = pnand %p403_p8, %p397_p5 }
  0x17   :  { %407 = shalt.err (!%p404_p9)
}
  0x18   :  { %20 = dma.hbm_to_vmem [thread:$0]  %s528_s0, 128, %s18_s20, [#allocation4]  }
  0x19   :  { %s416_s26 = scalar_lea.vmem %s39_s22, 2048  ;;  %p421_p11 = scmp.lt.s32.totalorder %s39_s22, %s39_s22 }
  0x1a   :  { %p417_p10 = scmp.ne.s32.totalorder %s39_s22, %s416_s26  ;;  %p422_p12 = scmp.lt.s32.totalorder %s416_s26, %s416_s26 }
  0x1c   :  { %p423_p13 = por %p422_p12, %p421_p11 }
  0x1e   :  { %p424_p0 = pnand %p423_p13, %p417_p10 }
  0x20   :  { %427 = shalt.err (!%p424_p0)
}
  0x21   :  { %44 = dma.hbm_to_vmem [thread:$0]  %s530_s2, 2048, %s39_s22, [#allocation7], %s455_s15, %s455_s15, %s456_s16  }
  0x22   :  { %448 = dma.done.wait [#allocation4], 128  }
  0x23   :  { %449 = vsyncadd [#allocation4], 4294967168 }
  0x24   :  { %450 = dma.done.wait [#allocation7], 4096  }
  0x25   :  { %451 = vsyncadd [#allocation7], 4294963200  ;;  %v459_v0 = vmov 0.0   ;;  %vm460_vm0 = vmmov 0   ;;  %v76_v1 = vld [vmem:[#allocation6 + $0x78] sm:$0xff]  ;;  %v75_v2 = vld [vmem:[#allocation6 + $0x70] sm:$0xff] }
  0x26   :  { %290 = vmatprep.subr.mxu0 %v459_v0  ;;  %322 = vmatprep.mubr.msk.f32.mxu0 %vm460_vm0, %v459_v0  ;;  %v74_v3 = vld [vmem:[#allocation6 + $0x68] sm:$0xff]  ;;  %v73_v4 = vld [vmem:[#allocation6 + $0x60] sm:$0xff]  ;;  %v168_v5 = vld [vmem:[#allocation8 + $0x78] sm:$0xff]  ;;  %s461_s0 = smov [#allocation9]  }
  0x27   :  { %325 = vmatprep.subr.mxu1 %v459_v0  ;;  %357 = vmatprep.mubr.msk.f32.mxu1 %vm460_vm0, %v459_v0  ;;  %v72_v6 = vld [vmem:[#allocation6 + $0x58] sm:$0xff]  ;;  %v167_v7 = vld [vmem:[#allocation8 + $0x70] sm:$0xff]  ;;  %v166_v8 = vld [vmem:[#allocation8 + $0x68] sm:$0xff]  ;;  %s246_s2 = sshll.u32 %s461_s0, 4  ;;  %s247_s2 = int_to_ptr.vmem [resolvable:$true] %s246_s2 }
  0x28   :  { %291 = vmatpush3.msra.mxu0 %v76_v1  ;;  %326 = vmatpush3.msra.mxu1 %v168_v5  ;;  %v71_v9 = vld [vmem:[#allocation6 + $0x50] sm:$0xff]  ;;  %v165_v10 = vld [vmem:[#allocation8 + $0x60] sm:$0xff]  ;;  %v70_v11 = vld [vmem:[#allocation6 + $0x48] sm:$0xff]  ;;  %s428_s28 = scalar_lea.vmem %s247_s2, 128  ;;  %p433_p2 = scmp.lt.s32.totalorder %s247_s2, %s247_s2 }
  0x29   :  { %292 = vmatprep.subr.mxu0 %v459_v0  ;;  %327 = vmatprep.subr.mxu1 %v459_v0  ;;  %v164_v12 = vld [vmem:[#allocation8 + $0x58] sm:$0xff]  ;;  %v69_v13 = vld [vmem:[#allocation6 + $0x40] sm:$0xff]  ;;  %v163_v14 = vld [vmem:[#allocation8 + $0x50] sm:$0xff]  ;;  %p429_p1 = scmp.ne.s32.totalorder %s247_s2, %s428_s28  ;;  %p434_p3 = scmp.lt.s32.totalorder %s428_s28, %s428_s28 }
  0x2a   :  { %293 = vmatpush3.msra.mxu0 %v75_v2  ;;  %328 = vmatpush3.msra.mxu1 %v167_v7  ;;  %v68_v15 = vld [vmem:[#allocation6 + $0x38] sm:$0xff]  ;;  %v162_v16 = vld [vmem:[#allocation8 + $0x48] sm:$0xff]  ;;  %v67_v17 = vld [vmem:[#allocation6 + $0x30] sm:$0xff] }
  0x2b   :  { %294 = vmatprep.subr.mxu0 %v459_v0  ;;  %329 = vmatprep.subr.mxu1 %v459_v0  ;;  %v161_v18 = vld [vmem:[#allocation8 + $0x40] sm:$0xff]  ;;  %v66_v19 = vld [vmem:[#allocation6 + $0x28] sm:$0xff]  ;;  %v160_v20 = vld [vmem:[#allocation8 + $0x38] sm:$0xff]  ;;  %p435_p4 = por %p434_p3, %p433_p2 }
  0x2c   :  { %295 = vmatpush3.msra.mxu0 %v74_v3  ;;  %330 = vmatpush3.msra.mxu1 %v166_v8  ;;  %v65_v21 = vld [vmem:[#allocation6 + $0x20] sm:$0xff]  ;;  %v159_v22 = vld [vmem:[#allocation8 + $0x30] sm:$0xff]  ;;  %v64_v23 = vld [vmem:[#allocation6 + $0x18] sm:$0xff] }
  0x2d   :  { %296 = vmatprep.subr.mxu0 %v459_v0  ;;  %331 = vmatprep.subr.mxu1 %v459_v0  ;;  %v158_v24 = vld [vmem:[#allocation8 + $0x28] sm:$0xff]  ;;  %v63_v25 = vld [vmem:[#allocation6 + $0x10] sm:$0xff]  ;;  %v157_v26 = vld [vmem:[#allocation8 + $0x20] sm:$0xff]  ;;  %p436_p5 = pnand %p435_p4, %p429_p1 }
  0x2e   :  { %297 = vmatpush3.msra.mxu0 %v73_v4  ;;  %332 = vmatpush3.msra.mxu1 %v165_v10  ;;  %v62_v27 = vld [vmem:[#allocation6 + $0x8] sm:$0xff]  ;;  %v156_v28 = vld [vmem:[#allocation8 + $0x18] sm:$0xff]  ;;  %v61_v29 = vld [vmem:[#allocation6] sm:$0xff] }
  0x2f   :  { %298 = vmatprep.subr.mxu0 %v459_v0  ;;  %333 = vmatprep.subr.mxu1 %v459_v0  ;;  %v60_v30 = vld [vmem:[#allocation3] sm:$0xff]  ;;  %v155_v31 = vld [vmem:[#allocation8 + $0x10] sm:$0xff]  ;;  %v154_v32 = vld [vmem:[#allocation8 + $0x8] sm:$0xff] }
  0x30   :  { %299 = vmatpush3.msra.mxu0 %v72_v6  ;;  %334 = vmatpush3.msra.mxu1 %v164_v12  ;;  %v153_v33 = vld [vmem:[#allocation8] sm:$0xff] }
  0x31   :  { %300 = vmatprep.subr.mxu0 %v459_v0  ;;  %335 = vmatprep.subr.mxu1 %v459_v0 }
  0x32   :  { %301 = vmatpush3.msra.mxu0 %v71_v9  ;;  %336 = vmatpush3.msra.mxu1 %v163_v14 }
  0x33   :  { %302 = vmatprep.subr.mxu0 %v459_v0  ;;  %337 = vmatprep.subr.mxu1 %v459_v0 }
  0x34   :  { %303 = vmatpush3.msra.mxu0 %v70_v11  ;;  %338 = vmatpush3.msra.mxu1 %v162_v16 }
  0x35   :  { %304 = vmatprep.subr.mxu0 %v459_v0  ;;  %339 = vmatprep.subr.mxu1 %v459_v0 }
  0x36   :  { %305 = vmatpush3.msra.mxu0 %v69_v13  ;;  %340 = vmatpush3.msra.mxu1 %v161_v18 }
  0x37   :  { %306 = vmatprep.subr.mxu0 %v459_v0  ;;  %341 = vmatprep.subr.mxu1 %v459_v0 }
  0x38   :  { %307 = vmatpush3.msra.mxu0 %v68_v15  ;;  %342 = vmatpush3.msra.mxu1 %v160_v20 }
  0x39   :  { %308 = vmatprep.subr.mxu0 %v459_v0  ;;  %343 = vmatprep.subr.mxu1 %v459_v0 }
  0x3a   :  { %309 = vmatpush3.msra.mxu0 %v67_v17  ;;  %344 = vmatpush3.msra.mxu1 %v159_v22 }
  0x3b   :  { %310 = vmatprep.subr.mxu0 %v459_v0  ;;  %345 = vmatprep.subr.mxu1 %v459_v0 }
  0x3c   :  { %311 = vmatpush3.msra.mxu0 %v66_v19  ;;  %346 = vmatpush3.msra.mxu1 %v158_v24 }
  0x3d   :  { %312 = vmatprep.subr.mxu0 %v459_v0  ;;  %347 = vmatprep.subr.mxu1 %v459_v0 }
  0x3e   :  { %313 = vmatpush3.msra.mxu0 %v65_v21  ;;  %348 = vmatpush3.msra.mxu1 %v157_v26 }
  0x3f   :  { %314 = vmatprep.subr.mxu0 %v459_v0  ;;  %349 = vmatprep.subr.mxu1 %v459_v0 }
  0x40   :  { %315 = vmatpush3.msra.mxu0 %v64_v23  ;;  %350 = vmatpush3.msra.mxu1 %v156_v28 }
  0x41   :  { %316 = vmatprep.subr.mxu0 %v459_v0  ;;  %351 = vmatprep.subr.mxu1 %v459_v0 }
  0x42   :  { %317 = vmatpush3.msra.mxu0 %v63_v25  ;;  %352 = vmatpush3.msra.mxu1 %v155_v31 }
  0x43   :  { %318 = vmatprep.subr.mxu0 %v459_v0  ;;  %353 = vmatprep.subr.mxu1 %v459_v0 }
  0x44   :  { %319 = vmatpush3.msra.mxu0 %v62_v27  ;;  %354 = vmatpush3.msra.mxu1 %v154_v32 }
  0x45   :  { %320 = vmatprep.subr.mxu0 %v459_v0  ;;  %355 = vmatprep.subr.mxu1 %v459_v0 }
  0x46   :  { %321 = vmatpush3.msra.mxu0 %v61_v29  ;;  %356 = vmatpush3.msra.mxu1 %v153_v33 }
  0x47   :  { %323 = vmatmul.mubr.f32.vlgmr.msra.gmra.mxu0 %v60_v30 }
 0x107   :  { %v143_v34 = vpop.f32.mrf.mxu0 }
 0x108   :  { %358 = vmatmul.mubr.f32.vlgmr.msra.gmra.mxu1 %v143_v34 }
 0x109   :  { %v324_v35 = vpop.f32.mrf.mxu0 }
 0x1c8   :  { %v235_v36 = vpop.f32.mrf.mxu1 }
 0x1c9   :  { %239 = vst [vmem:[#allocation9] sm:$0xff] %v235_v36 }
 0x1ca   :  { %v359_v37 = vpop.f32.mrf.mxu1 }
 0x1cb   :  { %439 = shalt.err (!%p436_p5)
}
 0x1cc   :  { %249 = dma.vmem_to_hbm [thread:$0]  %s247_s2, 128, %s531_s3, [#allocation5]  }
 0x1cd   :  { %452 = dma.done.wait [#allocation5], 128  }
 0x1ce   :  { %453 = vsyncadd [#allocation5], 4294967168 }
 0x1cf   :  { %253 = vsyncpa [#allocation4], 1 }
 0x1d0   :  { %254 = vsyncpa [#allocation7], 1 }
 0x1d1   :  { %255 = vsyncpa [#allocation5], 1 }

// kernel: tpu_custom_call.1
= control target key start
LH: loop header
LB: loop body
LE: loop exit
PB: predicated region body
PF: predicated region fallthrough
CT: control target
= control target key end

     0   :  { %8 = vsyncpa [#allocation4], 0  ;;  %s528_s0 = inlined_call_operand.hbm [shape: f32[8,128], index: 0, kind: input, shape index: {}]   ;;  %s529_s1 = inlined_call_operand.hbm [shape: f32[128,128], index: 1, kind: input, shape index: {}]   ;;  %s530_s2 = inlined_call_operand.hbm [shape: f32[128,128], index: 2, kind: input, shape index: {}]   ;;  %s531_s3 = inlined_call_operand.hbm [shape: f32[8,128], index: 3, kind: output, shape index: {}]  }
   0x1   :  { %9 = vsyncpa [#allocation7], 0 }
   0x2   :  { %10 = vsyncpa [#allocation5], 0  ;;  %s454_s12 = smov [#allocation6]  }
   0x3   :  { %s26_s13 = sshll.u32 %s454_s12, 4  ;;  %s27_s13 = int_to_ptr.vmem [resolvable:$true] %s26_s13 }
   0x4   :  { %s376_s14 = scalar_lea.vmem %s27_s13, 2048  ;;  %p381_p1 = scmp.lt.s32.totalorder %s27_s13, %s27_s13 }
   0x5   :  { %p377_p0 = scmp.ne.s32.totalorder %s27_s13, %s376_s14  ;;  %p382_p2 = scmp.lt.s32.totalorder %s376_s14, %s376_s14 }
   0x7   :  { %p383_p3 = por %p382_p2, %p381_p1 }
   0x9   :  { %p384_p4 = pnand %p383_p3, %p377_p0 }
   0xb   :  { %387 = shalt.err (!%p384_p4)
}
   0xc   :  { %s455_s15 = smov 128   ;;  %s456_s16 = smov 8  }
   0xd   :  { %32 = dma.hbm_to_vmem [thread:$0]  %s529_s1, 2048, %s27_s13, [#allocation7], %s455_s15, %s455_s15, %s456_s16  }
   0xe   :  { %s457_s19 = smov [#allocation3]   ;;  %s458_s21 = smov [#allocation8]  }
   0xf   :  { %s17_s20 = sshll.u32 %s457_s19, 4  ;;  %s38_s22 = sshll.u32 %s458_s21, 4  ;;  %s18_s20 = int_to_ptr.vmem [resolvable:$true] %s17_s20  ;;  %s39_s22 = int_to_ptr.vmem [resolvable:$true] %s38_s22 }
  0x10   :  { %s396_s23 = scalar_lea.vmem %s18_s20, 128  ;;  %p401_p6 = scmp.lt.s32.totalorder %s18_s20, %s18_s20 }
  0x11   :  { %p397_p5 = scmp.ne.s32.totalorder %s18_s20, %s396_s23  ;;  %p402_p7 = scmp.lt.s32.totalorder %s396_s23, %s396_s23 }
  0x13   :  { %p403_p8 = por %p402_p7, %p401_p6 }
  0x15   :  { %p404_p9 = pnand %p403_p8, %p397_p5 }
  0x17   :  { %407 = shalt.err (!%p404_p9)
}
  0x18   :  { %20 = dma.hbm_to_vmem [thread:$0]  %s528_s0, 128, %s18_s20, [#allocation4]  }
  0x19   :  { %s416_s26 = scalar_lea.vmem %s39_s22, 2048  ;;  %p421_p11 = scmp.lt.s32.totalorder %s39_s22, %s39_s22 }
  0x1a   :  { %p417_p10 = scmp.ne.s32.totalorder %s39_s22, %s416_s26  ;;  %p422_p12 = scmp.lt.s32.totalorder %s416_s26, %s416_s26 }
  0x1c   :  { %p423_p13 = por %p422_p12, %p421_p11 }
  0x1e   :  { %p424_p0 = pnand %p423_p13, %p417_p10 }
  0x20   :  { %427 = shalt.err (!%p424_p0)
}
  0x21   :  { %44 = dma.hbm_to_vmem [thread:$0]  %s530_s2, 2048, %s39_s22, [#allocation7], %s455_s15, %s455_s15, %s456_s16  }
  0x22   :  { %448 = dma.done.wait [#allocation4], 128  }
  0x23   :  { %449 = vsyncadd [#allocation4], 4294967168 }
  0x24   :  { %450 = dma.done.wait [#allocation7], 4096  }
  0x25   :  { %451 = vsyncadd [#allocation7], 4294963200  ;;  %v459_v0 = vmov 0.0   ;;  %vm460_vm0 = vmmov 0   ;;  %v76_v1 = vld [vmem:[#allocation6 + $0x78] sm:$0xff]  ;;  %v75_v2 = vld [vmem:[#allocation6 + $0x70] sm:$0xff] }
  0x26   :  { %290 = vmatprep.subr.mxu0 %v459_v0  ;;  %322 = vmatprep.mubr.msk.f32.mxu0 %vm460_vm0, %v459_v0  ;;  %v74_v3 = vld [vmem:[#allocation6 + $0x68] sm:$0xff]  ;;  %v73_v4 = vld [vmem:[#allocation6 + $0x60] sm:$0xff]  ;;  %v168_v5 = vld [vmem:[#allocation8 + $0x78] sm:$0xff]  ;;  %s461_s0 = smov [#allocation9]  }
  0x27   :  { %325 = vmatprep.subr.mxu1 %v459_v0  ;;  %357 = vmatprep.mubr.msk.f32.mxu1 %vm460_vm0, %v459_v0  ;;  %v72_v6 = vld [vmem:[#allocation6 + $0x58] sm:$0xff]  ;;  %v167_v7 = vld [vmem:[#allocation8 + $0x70] sm:$0xff]  ;;  %v166_v8 = vld [vmem:[#allocation8 + $0x68] sm:$0xff]  ;;  %s246_s2 = sshll.u32 %s461_s0, 4  ;;  %s247_s2 = int_to_ptr.vmem [resolvable:$true] %s246_s2 }
  0x28   :  { %291 = vmatpush3.msra.mxu0 %v76_v1  ;;  %326 = vmatpush3.msra.mxu1 %v168_v5  ;;  %v71_v9 = vld [vmem:[#allocation6 + $0x50] sm:$0xff]  ;;  %v165_v10 = vld [vmem:[#allocation8 + $0x60] sm:$0xff]  ;;  %v70_v11 = vld [vmem:[#allocation6 + $0x48] sm:$0xff]  ;;  %s428_s28 = scalar_lea.vmem %s247_s2, 128  ;;  %p433_p2 = scmp.lt.s32.totalorder %s247_s2, %s247_s2 }
  0x29   :  { %292 = vmatprep.subr.mxu0 %v459_v0  ;;  %327 = vmatprep.subr.mxu1 %v459_v0  ;;  %v164_v12 = vld [vmem:[#allocation8 + $0x58] sm:$0xff]  ;;  %v69_v13 = vld [vmem:[#allocation6 + $0x40] sm:$0xff]  ;;  %v163_v14 = vld [vmem:[#allocation8 + $0x50] sm:$0xff]  ;;  %p429_p1 = scmp.ne.s32.totalorder %s247_s2, %s428_s28  ;;  %p434_p3 = scmp.lt.s32.totalorder %s428_s28, %s428_s28 }
  0x2a   :  { %293 = vmatpush3.msra.mxu0 %v75_v2  ;;  %328 = vmatpush3.msra.mxu1 %v167_v7  ;;  %v68_v15 = vld [vmem:[#allocation6 + $0x38] sm:$0xff]  ;;  %v162_v16 = vld [vmem:[#allocation8 + $0x48] sm:$0xff]  ;;  %v67_v17 = vld [vmem:[#allocation6 + $0x30] sm:$0xff] }
  0x2b   :  { %294 = vmatprep.subr.mxu0 %v459_v0  ;;  %329 = vmatprep.subr.mxu1 %v459_v0  ;;  %v161_v18 = vld [vmem:[#allocation8 + $0x40] sm:$0xff]  ;;  %v66_v19 = vld [vmem:[#allocation6 + $0x28] sm:$0xff]  ;;  %v160_v20 = vld [vmem:[#allocation8 + $0x38] sm:$0xff]  ;;  %p435_p4 = por %p434_p3, %p433_p2 }
  0x2c   :  { %295 = vmatpush3.msra.mxu0 %v74_v3  ;;  %330 = vmatpush3.msra.mxu1 %v166_v8  ;;  %v65_v21 = vld [vmem:[#allocation6 + $0x20] sm:$0xff]  ;;  %v159_v22 = vld [vmem:[#allocation8 + $0x30] sm:$0xff]  ;;  %v64_v23 = vld [vmem:[#allocation6 + $0x18] sm:$0xff] }
  0x2d   :  { %296 = vmatprep.subr.mxu0 %v459_v0  ;;  %331 = vmatprep.subr.mxu1 %v459_v0  ;;  %v158_v24 = vld [vmem:[#allocation8 + $0x28] sm:$0xff]  ;;  %v63_v25 = vld [vmem:[#allocation6 + $0x10] sm:$0xff]  ;;  %v157_v26 = vld [vmem:[#allocation8 + $0x20] sm:$0xff]  ;;  %p436_p5 = pnand %p435_p4, %p429_p1 }
  0x2e   :  { %297 = vmatpush3.msra.mxu0 %v73_v4  ;;  %332 = vmatpush3.msra.mxu1 %v165_v10  ;;  %v62_v27 = vld [vmem:[#allocation6 + $0x8] sm:$0xff]  ;;  %v156_v28 = vld [vmem:[#allocation8 + $0x18] sm:$0xff]  ;;  %v61_v29 = vld [vmem:[#allocation6] sm:$0xff] }
  0x2f   :  { %298 = vmatprep.subr.mxu0 %v459_v0  ;;  %333 = vmatprep.subr.mxu1 %v459_v0  ;;  %v60_v30 = vld [vmem:[#allocation3] sm:$0xff]  ;;  %v155_v31 = vld [vmem:[#allocation8 + $0x10] sm:$0xff]  ;;  %v154_v32 = vld [vmem:[#allocation8 + $0x8] sm:$0xff] }
  0x30   :  { %299 = vmatpush3.msra.mxu0 %v72_v6  ;;  %334 = vmatpush3.msra.mxu1 %v164_v12  ;;  %v153_v33 = vld [vmem:[#allocation8] sm:$0xff] }
  0x31   :  { %300 = vmatprep.subr.mxu0 %v459_v0  ;;  %335 = vmatprep.subr.mxu1 %v459_v0 }
  0x32   :  { %301 = vmatpush3.msra.mxu0 %v71_v9  ;;  %336 = vmatpush3.msra.mxu1 %v163_v14 }
  0x33   :  { %302 = vmatprep.subr.mxu0 %v459_v0  ;;  %337 = vmatprep.subr.mxu1 %v459_v0 }
  0x34   :  { %303 = vmatpush3.msra.mxu0 %v70_v11  ;;  %338 = vmatpush3.msra.mxu1 %v162_v16 }
  0x35   :  { %304 = vmatprep.subr.mxu0 %v459_v0  ;;  %339 = vmatprep.subr.mxu1 %v459_v0 }
  0x36   :  { %305 = vmatpush3.msra.mxu0 %v69_v13  ;;  %340 = vmatpush3.msra.mxu1 %v161_v18 }
  0x37   :  { %306 = vmatprep.subr.mxu0 %v459_v0  ;;  %341 = vmatprep.subr.mxu1 %v459_v0 }
  0x38   :  { %307 = vmatpush3.msra.mxu0 %v68_v15  ;;  %342 = vmatpush3.msra.mxu1 %v160_v20 }
  0x39   :  { %308 = vmatprep.subr.mxu0 %v459_v0  ;;  %343 = vmatprep.subr.mxu1 %v459_v0 }
  0x3a   :  { %309 = vmatpush3.msra.mxu0 %v67_v17  ;;  %344 = vmatpush3.msra.mxu1 %v159_v22 }
  0x3b   :  { %310 = vmatprep.subr.mxu0 %v459_v0  ;;  %345 = vmatprep.subr.mxu1 %v459_v0 }
  0x3c   :  { %311 = vmatpush3.msra.mxu0 %v66_v19  ;;  %346 = vmatpush3.msra.mxu1 %v158_v24 }
  0x3d   :  { %312 = vmatprep.subr.mxu0 %v459_v0  ;;  %347 = vmatprep.subr.mxu1 %v459_v0 }
  0x3e   :  { %313 = vmatpush3.msra.mxu0 %v65_v21  ;;  %348 = vmatpush3.msra.mxu1 %v157_v26 }
  0x3f   :  { %314 = vmatprep.subr.mxu0 %v459_v0  ;;  %349 = vmatprep.subr.mxu1 %v459_v0 }
  0x40   :  { %315 = vmatpush3.msra.mxu0 %v64_v23  ;;  %350 = vmatpush3.msra.mxu1 %v156_v28 }
  0x41   :  { %316 = vmatprep.subr.mxu0 %v459_v0  ;;  %351 = vmatprep.subr.mxu1 %v459_v0 }
  0x42   :  { %317 = vmatpush3.msra.mxu0 %v63_v25  ;;  %352 = vmatpush3.msra.mxu1 %v155_v31 }
  0x43   :  { %318 = vmatprep.subr.mxu0 %v459_v0  ;;  %353 = vmatprep.subr.mxu1 %v459_v0 }
  0x44   :  { %319 = vmatpush3.msra.mxu0 %v62_v27  ;;  %354 = vmatpush3.msra.mxu1 %v154_v32 }
  0x45   :  { %320 = vmatprep.subr.mxu0 %v459_v0  ;;  %355 = vmatprep.subr.mxu1 %v459_v0 }
  0x46   :  { %321 = vmatpush3.msra.mxu0 %v61_v29  ;;  %356 = vmatpush3.msra.mxu1 %v153_v33 }
  0x47   :  { %323 = vmatmul.mubr.f32.vlgmr.msra.gmra.mxu0 %v60_v30 }
 0x107   :  { %v143_v34 = vpop.f32.mrf.mxu0 }
 0x108   :  { %358 = vmatmul.mubr.f32.vlgmr.msra.gmra.mxu1 %v143_v34 }
 0x109   :  { %v324_v35 = vpop.f32.mrf.mxu0 }
 0x1c8   :  { %v235_v36 = vpop.f32.mrf.mxu1 }
 0x1c9   :  { %239 = vst [vmem:[#allocation9] sm:$0xff] %v235_v36 }
 0x1ca   :  { %v359_v37 = vpop.f32.mrf.mxu1 }
 0x1cb   :  { %439 = shalt.err (!%p436_p5)
}
 0x1cc   :  { %249 = dma.vmem_to_hbm [thread:$0]  %s247_s2, 128, %s531_s3, [#allocation5]  }
 0x1cd   :  { %452 = dma.done.wait [#allocation5], 128  }
 0x1ce   :  { %453 = vsyncadd [#allocation5], 4294967168 }
 0x1cf   :  { %253 = vsyncpa [#allocation4], 1 }
 0x1d0   :  { %254 = vsyncpa [#allocation7], 1 }
 0x1d1   :  { %255 = vsyncpa [#allocation5], 1 }

</bundles_post_ra>
